<compile_context>
chip_gen: v7x
topology: tpu7x:2x2x1
jax: 0.10.0
libtpu: 0.0.40
codegen_flags: <defaults>
</compile_context>

<pallas_src>
import functools

import jax
import jax.numpy as jnp
from jax.experimental import pallas as pl
from jax.experimental.pallas import tpu as pltpu


def _ensemble_kernel(x_ref, y_ref, w1x_ref, w1y_ref, b1_ref, w2_ref, b2m_ref,
                     sig_ref, lr_ref, *, matmul_dtype):
    # In-kernel cast (VPU) of the activation tiles to the MXU operand dtype.
    x = x_ref[...].astype(matmul_dtype)
    y = y_ref[...].astype(matmul_dtype)

    # Fused hidden layer for all E estimators: (TB, E*H) on the MXU.
    # concat(inputs, outputs) is never materialized; the K dim is split.
    h = (jnp.dot(x, w1x_ref[...], preferred_element_type=jnp.float32)
         + jnp.dot(y, w1y_ref[...], preferred_element_type=jnp.float32)
         + b1_ref[...])
    h = jnp.maximum(h, 0.0)                                   # ReLU (f32 VPU)

    # Second layer + ensemble mean fused into one MXU dot, emitted directly as
    # a lane-dense (1, TB) row.  w2_row already carries the 1/E scale; the
    # dot_general contracts dim 1 of both operands (NT matmul).
    mean_lr = jax.lax.dot_general(
        w2_ref[...], h.astype(matmul_dtype),
        dimension_numbers=(((1,), (1,)), ((), ())),
        preferred_element_type=jnp.float32) + b2m_ref[0]      # (1, TB)

    lr_ref[...] = mean_lr
    sig_ref[...] = jax.nn.sigmoid(mean_lr)                    # EUP


def prepare_ensemble_params(params, d_in, *, matmul_dtype=jnp.float32):
    """One-time repack of the E member parameters for the fused kernel."""
    w1, b1, w2, b2 = params                  # (E,D,H), (E,H), (E,H), (E,)
    E, D, H = w1.shape
    EH = E * H
    # Stack the E estimators along the lane axis of one first-layer matmul,
    # split into the inputs / outputs halves so concat() is never formed.
    w1_all = jnp.transpose(w1, (1, 0, 2)).reshape(D, EH)      # col e*H+h = w1[e,:,h]
    w1x = w1_all[:d_in].astype(matmul_dtype)                  # (d_in,  E*H)
    w1y = w1_all[d_in:].astype(matmul_dtype)                  # (d_out, E*H)
    b1_row = b1.reshape(1, EH).astype(jnp.float32)            # (1, E*H), f32 add
    # reduce='mean': fold the 1/E scale into the second-layer weights / bias.
    w2_row = (w2.reshape(1, EH) / E).astype(matmul_dtype)     # (1, E*H)
    b2_mean = (jnp.sum(b2) / E).reshape(1).astype(jnp.float32)  # (1,) SMEM scalar
    return w1x, w1y, b1_row, w2_row, b2_mean


def _round_up(x, m):
    return ((x + m - 1) // m) * m


def ensemble_forward(inputs, outputs, prepared_params, *, block_b=512):
    """Ensemble forward.  Returns (sigmoid(log_ratios), log_ratios), each (B,)."""
    w1x, w1y, b1_row, w2_row, b2_mean = prepared_params
    d_in, EH = w1x.shape
    d_out = w1y.shape[0]
    assert inputs.shape[-1] == d_in and outputs.shape[-1] == d_out
    B = inputs.shape[0]
    matmul_dtype = w1x.dtype

    # Batch tiling.  Lane-dense (1, tb) output blocks need tb % 128 == 0
    # unless tb == B; for B > 256 keep >= 2 tiles so both v7x TensorCores
    # (and megacore) get work.  The last tile may be ragged (no wrapper pad).
    if B <= 256:
        tb = B
    else:
        tb = min(block_b, _round_up(pl.cdiv(B, 2), 128))
    n_tiles = pl.cdiv(B, tb)

    # VMEM budget from the actual tile sizes (generous 2x margin), clamped to
    # [32 MiB, 64 MiB] (v7x physical VMEM is 64 MiB; v5e/v6e have 128 MiB).
    weight_bytes = sum(int(a.size) * a.dtype.itemsize
                       for a in (w1x, w1y, b1_row, w2_row))
    act_bytes = 2 * tb * (d_in + d_out) * inputs.dtype.itemsize   # x/y, 2-buffered
    out_bytes = 2 * 2 * tb * 4                                    # sig/lr rows
    h_bytes = tb * EH * (4 + jnp.dtype(matmul_dtype).itemsize)    # h + mm-dtype copy
    est = 2 * weight_bytes + act_bytes + out_bytes + h_bytes
    vmem_limit = int(min(64 * 2**20, max(32 * 2**20, 2 * est + (4 << 20))))

    kernel = functools.partial(_ensemble_kernel, matmul_dtype=matmul_dtype)

    sig, lr = pl.pallas_call(
        kernel,
        out_shape=(jax.ShapeDtypeStruct((1, B), jnp.float32),
                   jax.ShapeDtypeStruct((1, B), jnp.float32)),
        grid=(n_tiles,),
        in_specs=[
            pl.BlockSpec((tb, d_in), lambda i: (i, 0)),       # inputs tile
            pl.BlockSpec((tb, d_out), lambda i: (i, 0)),      # outputs tile
            # Resident weights: constant index_map, single-buffered.
            pl.BlockSpec((d_in, EH), lambda i: (0, 0),
                         pipeline_mode=pl.Buffered(1)),       # W1[:d_in]
            pl.BlockSpec((d_out, EH), lambda i: (0, 0),
                         pipeline_mode=pl.Buffered(1)),       # W1[d_in:]
            pl.BlockSpec((1, EH), lambda i: (0, 0),
                         pipeline_mode=pl.Buffered(1)),       # b1
            pl.BlockSpec((1, EH), lambda i: (0, 0),
                         pipeline_mode=pl.Buffered(1)),       # w2 / E
            pl.BlockSpec(memory_space=pltpu.MemorySpace.SMEM),  # mean(b2) scalar
        ],
        out_specs=(
            pl.BlockSpec((1, tb), lambda i: (0, i)),          # sigmoid(mean_lr)
            pl.BlockSpec((1, tb), lambda i: (0, i)),          # mean_lr
        ),
        compiler_params=pltpu.CompilerParams(
            dimension_semantics=("parallel",),
            vmem_limit_bytes=vmem_limit),
    )(inputs, outputs, w1x, w1y, b1_row, w2_row, b2_mean)

    return sig[0], lr[0]


def _reference_forward(inputs, outputs, params):
    w1, b1, w2, b2 = params
    z = jnp.concatenate([inputs, outputs], axis=-1).astype(jnp.float32)      # (B, D)
    h = jnp.maximum(jnp.einsum('bd,edh->ebh', z, w1) + b1[:, None, :], 0.0)  # (E,B,H)
    lrs = jnp.einsum('ebh,eh->eb', h, w2) + b2[:, None]                      # (E,B)
    mean_lr = lrs.T.mean(axis=1)                                             # (B,)
    return jax.nn.sigmoid(mean_lr), mean_lr


if __name__ == "__main__":
    key = jax.random.PRNGKey(0)
    B, D_IN, D_OUT, H, E = 8, 4, 4, 32, 4
    D = D_IN + D_OUT

    k_in, k_out, k_w1, k_b1, k_w2, k_b2 = jax.random.split(key, 6)
    inputs = jax.random.normal(k_in, (B, D_IN), dtype=jnp.float32)
    outputs = jax.random.normal(k_out, (B, D_OUT), dtype=jnp.float32)

    # deterministic synthetic parameters for the E member estimators
    w1 = 0.1 * jax.random.normal(k_w1, (E, D, H), dtype=jnp.float32)
    b1 = 0.1 * jax.random.normal(k_b1, (E, H), dtype=jnp.float32)
    w2 = 0.1 * jax.random.normal(k_w2, (E, H), dtype=jnp.float32)
    b2 = 0.1 * jax.random.normal(k_b2, (E,), dtype=jnp.float32)
    params = (w1, b1, w2, b2)

    sig_ref_v, lr_ref_v = _reference_forward(inputs, outputs, params)

    # One-time parameter preparation (hoisted out of the forward path).
    prep_f32 = prepare_ensemble_params(params, D_IN)
    prep_bf16 = prepare_ensemble_params(params, D_IN, matmul_dtype=jnp.bfloat16)

    # f32 MXU path (v5e-friendly, tight tolerance), single small tile.
    sig, lr = ensemble_forward(inputs, outputs, prep_f32)
    jax.block_until_ready((sig, lr))
    assert sig.shape == (B,) and lr.shape == (B,)
    assert jnp.allclose(lr, lr_ref_v, atol=1e-5), "log_ratio mismatch (f32)"
    assert jnp.allclose(sig, sig_ref_v, atol=1e-5), "sigmoid mismatch (f32)"

    # bf16 MXU-operand path (v6e/v7x); accumulation / bias / ReLU stay f32.
    sig_bf, lr_bf = ensemble_forward(inputs, outputs, prep_bf16)
    jax.block_until_ready((sig_bf, lr_bf))
    assert jnp.allclose(lr_bf, lr_ref_v, atol=2e-2), "log_ratio mismatch (bf16)"
    assert jnp.allclose(sig_bf, sig_ref_v, atol=2e-2), "sigmoid mismatch (bf16)"

    # Multi-tile + ragged-last-block path (B not a multiple of the tile size).
    B2 = 300
    k2a, k2b = jax.random.split(jax.random.PRNGKey(1))
    inputs2 = jax.random.normal(k2a, (B2, D_IN), dtype=jnp.float32)
    outputs2 = jax.random.normal(k2b, (B2, D_OUT), dtype=jnp.float32)
    sig2_ref, lr2_ref = _reference_forward(inputs2, outputs2, params)
    sig2, lr2 = ensemble_forward(inputs2, outputs2, prep_f32)
    jax.block_until_ready((sig2, lr2))
    assert sig2.shape == (B2,) and lr2.shape == (B2,)
    assert jnp.allclose(lr2, lr2_ref, atol=1e-5), "log_ratio mismatch (multi-tile)"
    assert jnp.allclose(sig2, sig2_ref, atol=1e-5), "sigmoid mismatch (multi-tile)"

    print("KERNEL_OK")
</pallas_src>

<mosaic_0001>
module attributes {stable_mosaic.version = 11 : i64} {
  func.func @_ensemble_kernel(%arg0: i32, %arg1: memref<8x4xf32, #tpu.memory_space<vmem>>, %arg2: memref<8x4xf32, #tpu.memory_space<vmem>>, %arg3: memref<4x128xf32, #tpu.memory_space<vmem>>, %arg4: memref<4x128xf32, #tpu.memory_space<vmem>>, %arg5: memref<1x128xf32, #tpu.memory_space<vmem>>, %arg6: memref<1x128xf32, #tpu.memory_space<vmem>>, %arg7: memref<1xf32, #tpu.memory_space<smem>>, %arg8: memref<1x8xf32, #tpu.memory_space<vmem>>, %arg9: memref<1x8xf32, #tpu.memory_space<vmem>>) attributes {dimension_semantics = [#tpu.dimension_semantics<parallel>], iteration_bounds = array<i64: 1>, scalar_prefetch = 0 : i64, scratch_operands = 0 : i64, tpu.core_type = #tpu.core_type<tc>, window_params = [{transform_indices = @transform_0, window_bounds = array<i64: 8, 4>}, {transform_indices = @transform_1, window_bounds = array<i64: 8, 4>}, {pipeline_mode = #tpu.pipeline_mode<synchronous>, transform_indices = @transform_2, window_bounds = array<i64: 4, 128>}, {pipeline_mode = #tpu.pipeline_mode<synchronous>, transform_indices = @transform_3, window_bounds = array<i64: 4, 128>}, {pipeline_mode = #tpu.pipeline_mode<synchronous>, transform_indices = @transform_4, window_bounds = array<i64: 1, 128>}, {pipeline_mode = #tpu.pipeline_mode<synchronous>, transform_indices = @transform_5, window_bounds = array<i64: 1, 128>}, {transform_indices = @transform_6, window_bounds = array<i64: 1>}, {transform_indices = @transform_7, window_bounds = array<i64: 1, 8>}, {transform_indices = @transform_8, window_bounds = array<i64: 1, 8>}]} {
    %c0 = arith.constant 0 : index
    %c0_0 = arith.constant 0 : index
    %0 = vector.load %arg1[%c0, %c0_0] : memref<8x4xf32, #tpu.memory_space<vmem>>, vector<8x4xf32>
    %c0_1 = arith.constant 0 : index
    %c0_2 = arith.constant 0 : index
    %1 = vector.load %arg2[%c0_1, %c0_2] : memref<8x4xf32, #tpu.memory_space<vmem>>, vector<8x4xf32>
    %c0_3 = arith.constant 0 : index
    %c0_4 = arith.constant 0 : index
    %2 = vector.load %arg3[%c0_3, %c0_4] : memref<4x128xf32, #tpu.memory_space<vmem>>, vector<4x128xf32>
    %cst = arith.constant dense<0.000000e+00> : vector<8x128xf32>
    %3 = tpu.matmul %0, %2, %cst {dimension_numbers = #tpu.dot_dimension_numbers<[1], [0], [0], [1], [0, 0, 1, 1], [], []>} : vector<8x4xf32>, vector<4x128xf32>, vector<8x128xf32> -> vector<8x128xf32>
    %c0_5 = arith.constant 0 : index
    %c0_6 = arith.constant 0 : index
    %4 = vector.load %arg4[%c0_5, %c0_6] : memref<4x128xf32, #tpu.memory_space<vmem>>, vector<4x128xf32>
    %cst_7 = arith.constant dense<0.000000e+00> : vector<8x128xf32>
    %5 = tpu.matmul %1, %4, %cst_7 {dimension_numbers = #tpu.dot_dimension_numbers<[1], [0], [0], [1], [0, 0, 1, 1], [], []>} : vector<8x4xf32>, vector<4x128xf32>, vector<8x128xf32> -> vector<8x128xf32>
    %6 = arith.addf %3, %5 : vector<8x128xf32>
    %c0_8 = arith.constant 0 : index
    %c0_9 = arith.constant 0 : index
    %7 = vector.load %arg5[%c0_8, %c0_9] : memref<1x128xf32, #tpu.memory_space<vmem>>, vector<1x128xf32>
    %8 = vector.broadcast %7 : vector<1x128xf32> to vector<8x128xf32>
    %9 = arith.addf %6, %8 : vector<8x128xf32>
    %cst_10 = arith.constant 0.000000e+00 : f32
    %10 = vector.broadcast %cst_10 : f32 to vector<8x128xf32>
    %11 = arith.maximumf %9, %10 : vector<8x128xf32>
    %c0_11 = arith.constant 0 : index
    %c0_12 = arith.constant 0 : index
    %12 = vector.load %arg6[%c0_11, %c0_12] : memref<1x128xf32, #tpu.memory_space<vmem>>, vector<1x128xf32>
    %cst_13 = arith.constant dense<0.000000e+00> : vector<1x8xf32>
    %13 = tpu.matmul %12, %11, %cst_13 {dimension_numbers = #tpu.dot_dimension_numbers<[1], [1], [0], [0], [0, 0, 1, 0], [], []>} : vector<1x128xf32>, vector<8x128xf32>, vector<1x8xf32> -> vector<1x8xf32>
    %c0_14 = arith.constant 0 : index
    %14 = memref.load %arg7[%c0_14] : memref<1xf32, #tpu.memory_space<smem>>
    %15 = vector.broadcast %14 : f32 to vector<1x8xf32>
    %16 = arith.addf %13, %15 : vector<1x8xf32>
    %c0_15 = arith.constant 0 : index
    %c0_16 = arith.constant 0 : index
    %17 = vector.load %arg9[%c0_15, %c0_16] : memref<1x8xf32, #tpu.memory_space<vmem>>, vector<1x8xf32>
    tpu.vector_store %arg9[%c0_15, %c0_16], %16 {strides = array<i32>} : memref<1x8xf32, #tpu.memory_space<vmem>>, vector<1x8xf32>,
    %18 = arith.negf %16 : vector<1x8xf32>
    %19 = math.exp %18 : vector<1x8xf32>
    %cst_17 = arith.constant 1.000000e+00 : f32
    %20 = vector.broadcast %cst_17 : f32 to vector<1x8xf32>
    %21 = arith.addf %20, %19 : vector<1x8xf32>
    %22 = arith.divf %20, %21 : vector<1x8xf32>
    %c0_18 = arith.constant 0 : index
    %c0_19 = arith.constant 0 : index
    %23 = vector.load %arg8[%c0_18, %c0_19] : memref<1x8xf32, #tpu.memory_space<vmem>>, vector<1x8xf32>
    tpu.vector_store %arg8[%c0_18, %c0_19], %22 {strides = array<i32>} : memref<1x8xf32, #tpu.memory_space<vmem>>, vector<1x8xf32>,
    return
  }
  func.func @transform_0(%arg0: i32) -> (i32, i32) {
    %c0_i32 = arith.constant 0 : i32
    %c0_i32_0 = arith.constant 0 : i32
    return %arg0, %c0_i32 : i32, i32
  }
  func.func @transform_1(%arg0: i32) -> (i32, i32) {
    %c0_i32 = arith.constant 0 : i32
    %c0_i32_0 = arith.constant 0 : i32
    return %arg0, %c0_i32 : i32, i32
  }
  func.func @transform_2(%arg0: i32) -> (i32, i32) {
    %c0_i32 = arith.constant 0 : i32
    %c0_i32_0 = arith.constant 0 : i32
    %c0_i32_1 = arith.constant 0 : i32
    return %c0_i32, %c0_i32_0 : i32, i32
  }
  func.func @transform_3(%arg0: i32) -> (i32, i32) {
    %c0_i32 = arith.constant 0 : i32
    %c0_i32_0 = arith.constant 0 : i32
    %c0_i32_1 = arith.constant 0 : i32
    return %c0_i32, %c0_i32_0 : i32, i32
  }
  func.func @transform_4(%arg0: i32) -> (i32, i32) {
    %c0_i32 = arith.constant 0 : i32
    %c0_i32_0 = arith.constant 0 : i32
    %c0_i32_1 = arith.constant 0 : i32
    return %c0_i32, %c0_i32_0 : i32, i32
  }
  func.func @transform_5(%arg0: i32) -> (i32, i32) {
    %c0_i32 = arith.constant 0 : i32
    %c0_i32_0 = arith.constant 0 : i32
    %c0_i32_1 = arith.constant 0 : i32
    return %c0_i32, %c0_i32_0 : i32, i32
  }
  func.func @transform_6(%arg0: i32) -> i32 {
    %c0_i32 = arith.constant 0 : i32
    %c0_i32_0 = arith.constant 0 : i32
    return %c0_i32 : i32
  }
  func.func @transform_7(%arg0: i32) -> (i32, i32) {
    %c0_i32 = arith.constant 0 : i32
    %c0_i32_0 = arith.constant 0 : i32
    return %c0_i32, %arg0 : i32, i32
  }
  func.func @transform_8(%arg0: i32) -> (i32, i32) {
    %c0_i32 = arith.constant 0 : i32
    %c0_i32_0 = arith.constant 0 : i32
    return %c0_i32, %arg0 : i32, i32
  }
}

</mosaic_0001>

<bundles_post_ra>
// kernel: tpu_custom_call.1
= control target key start
LH: loop header
LB: loop body
LE: loop exit
PB: predicated region body
PF: predicated region fallthrough
CT: control target
= control target key end

     0   :  { %15 = vsyncpa [#allocation4], 0  ;;  %vm39_vm0 = vcmask 1043456   ;;  %v391_v2 = vmov 0.0   ;;  %vm35_vm1 = vcmask 31744   ;;  %s487_s0 = inlined_call_operand.vmem [shape: f32[8,4], index: 0, kind: input, shape index: {}]   ;;  %s488_s1 = inlined_call_operand.vmem [shape: f32[8,4], index: 1, kind: input, shape index: {}]   ;;  %s489_s2 = inlined_call_operand.vmem [shape: f32[4,128], index: 2, kind: input, shape index: {}]   ;;  %s490_s3 = inlined_call_operand.vmem [shape: f32[4,128], index: 3, kind: input, shape index: {}]   ;;  %s491_s4 = inlined_call_operand.vmem [shape: f32[1,128], index: 4, kind: input, shape index: {}]   ;;  %s492_s5 = inlined_call_operand.vmem [shape: f32[1,128], index: 5, kind: input, shape index: {}]   ;;  %s493_s6 = inlined_call_operand.<no memory space> [shape: f32[1], index: 6, kind: input, shape index: {}]   ;;  %s494_s7 = inlined_call_operand.hbm [shape: f32[1,8], index: 7, kind: output, shape index: {0}]   ;;  %s495_s8 = inlined_call_operand.hbm [shape: f32[1,8], index: 8, kind: output, shape index: {1}]  }
   0x1   :  { %v34_v0 = vld [vmem:[%s490_s3] sm:$0xf]  ;;  %320 = vmatprep.subr.mxu0 %v391_v2  ;;  %325 = vmatprep.subr.mxu1 %v391_v2 }
   0x2   :  { %v32_v1 = vld [vmem:[%s488_s1] sm:$0xff] }
   0x3   :  { %v33_v3 = vld [vmem:[%s489_s2] sm:$0xf] }
   0x4   :  { %v31_v4 = vld [vmem:[%s487_s0] sm:$0xff] }
   0x5   :  { %16 = vsyncpa [#allocation6], 0  ;;  %321 = vmatpush3.msk.msra.mxu0 %vm39_vm0, %v34_v0  ;;  %vm392_vm2 = vmmov 0   ;;  %326 = vmatpush3.msk.msra.mxu1 %vm39_vm0, %v33_v3  ;;  %v312_v7 = vld [vmem:[%s491_s4] ss:$0 sm:$0xff]  ;;  %v200_v14 = vstv %s493_s6  ;;  %s393_s15 = smov [#allocation5]  }
   0x6   :  { %322 = vmatprep.mubr.msk.f32.mxu0 %vm392_vm2, %v391_v2  ;;  %327 = vmatprep.mubr.msk.f32.mxu1 %vm392_vm2, %v391_v2  ;;  %v198_v13 = vld [vmem:[%s492_s5] sm:$0x1]  ;;  %s296_s16 = sshll.u32 %s393_s15, 4  ;;  %vm271_vm3 = vcmask 57344   ;;  %s297_s16 = int_to_ptr.vmem [resolvable:$true] %s296_s16 }
   0x7   :  { %323 = vmatmul.mubr.msk.f32.vlgmr.msra.gmra.mrb[0].mxu0 %vm35_vm1, %v32_v1  ;;  %328 = vmatmul.mubr.msk.f32.vlgmr.msra.gmra.mrb[0].mxu1 %vm35_vm1, %v31_v4  ;;  %s343_s4 = scalar_lea.vmem %s297_s16, 16  ;;  %s347_s17 = scalar_lea.vmem %s297_s16, 32 }
   0x8   :  { %330 = vmatprep.subr.mxu0 %v391_v2  ;;  %332 = vmatprep.mubr.msk.f32.mxu0 %vm392_vm2, %v391_v2  ;;  %p344_p0 = scmp.ne.s32.totalorder %s297_s16, %s343_s4  ;;  %p348_p1 = scmp.lt.s32.totalorder %s297_s16, %s297_s16 }
   0x9   :  { %p349_p2 = scmp.lt.s32.totalorder %s347_s17, %s343_s4 }
   0xb   :  { %p350_p3 = por %p349_p2, %p348_p1 }
   0xd   :  { %p351_p4 = pnand %p350_p3, %p344_p0 }
  0xda   :  { %v109_v5 = vpop.f32.mrb[0].mxu0  ;;  %v185_v6 = vpop.f32.mrb[0].mxu1 }
  0xdb   :  { %v186_v8 = vadd.f32 %v185_v6, %v109_v5  ;;  %v324_v9 = vpop.f32.mrb[1].mxu0  ;;  %v329_v10 = vpop.f32.mrb[1].mxu1 }
  0xdd   :  { %v196_v11 = vadd.f32 %v312_v7, %v186_v8 }
  0xdf   :  { %v197_v12 = vmax.f32 %v196_v11, 0.0 }
  0xe1   :  { %331 = vmatpush3.xpose.msra.mxu0 %v197_v12 }
  0xe4   :  { %333 = vmatmul.mubr.f32.vlgmr.msra.gmra.mrb[2].mxu0 %v198_v13 }
 0x1b7   :  { %v267_v15 = vpop.f32.mrb[2].mxu0 }
 0x1b8   :  { %v268_v16 = vadd.f32 %v267_v15, %v200_v14  ;;  %v334_v17 = vpop.f32.mrb[3].mxu0 }
 0x1ba   :  { %v313_v18 = vmul.f32 -1.442695, %v268_v16  ;;  %272 = vst.msk [vmem:[#allocation5] sm:$0x1] %vm271_vm3, %v268_v16 }
 0x1bb   :  { %354 = shalt.err (!%p351_p4)
}
 0x1bc   :  { %s355_s18 = scalar_lea.hbm %s495_s8, 16 }
 0x1bd   :  { %p356_p5 = scmp.ne.s32.totalorder %s495_s8, %s355_s18  ;;  %p359_p6 = scmp.lt.u32.totalorder %s355_s18, %s495_s8 }
 0x1bf   :  { %p361_p7 = pnand %p359_p6, %p356_p5 }
 0x1c1   :  { %364 = shalt.err (!%p361_p7)
}
 0x1c2   :  { %299 = dma.vmem_to_hbm [thread:$0]  %s297_s16, 16, %s495_s8, [#allocation6]   ;;  %339 = vpow2.f32 %v313_v18 }
 0x1c3   :  { %s394_s25 = smov [#allocation3]  }
 0x1c4   :  { %s286_s26 = sshll.u32 %s394_s25, 4  ;;  %s287_s26 = int_to_ptr.vmem [resolvable:$true] %s286_s26 }
 0x1c5   :  { %s365_s27 = scalar_lea.vmem %s287_s26, 16  ;;  %s369_s28 = scalar_lea.vmem %s287_s26, 32 }
 0x1c6   :  { %p366_p8 = scmp.ne.s32.totalorder %s287_s26, %s365_s27  ;;  %p370_p9 = scmp.lt.s32.totalorder %s287_s26, %s287_s26 }
 0x1c7   :  { %p371_p10 = scmp.lt.s32.totalorder %s369_s28, %s365_s27 }
 0x1c9   :  { %p372_p11 = por %p371_p10, %p370_p9 }
 0x1cb   :  { %p373_p12 = pnand %p372_p11, %p366_p8 }
 0x1cc   :  { %v340_v19 = vpop.eup %339 }
 0x1cd   :  { %v276_v20 = vadd.f32 1.0, %v340_v19 }
 0x1cf   :  { %341 = vrcp.f32 %v276_v20 }
 0x1d9   :  { %v342_v21 = vpop.eup %341 }
 0x1da   :  { %279 = vst.msk [vmem:[#allocation3] sm:$0x1] %vm271_vm3, %v342_v21 }
 0x1db   :  { %376 = shalt.err (!%p373_p12)
}
 0x1dc   :  { %s377_s30 = scalar_lea.hbm %s494_s7, 16 }
 0x1dd   :  { %p378_p13 = scmp.ne.s32.totalorder %s494_s7, %s377_s30  ;;  %p381_p0 = scmp.lt.u32.totalorder %s377_s30, %s494_s7 }
 0x1df   :  { %p383_p1 = pnand %p381_p0, %p378_p13 }
 0x1e1   :  { %386 = shalt.err (!%p383_p1)
}
 0x1e2   :  { %289 = dma.vmem_to_hbm [thread:$0]  %s287_s26, 16, %s494_s7, [#allocation4]  }
 0x1e3   :  { %387 = dma.done.wait [#allocation4], 16  }
 0x1e4   :  { %388 = vsyncadd [#allocation4], 4294967280 }
 0x1e5   :  { %389 = dma.done.wait [#allocation6], 16  }
 0x1e6   :  { %390 = vsyncadd [#allocation6], 4294967280 }
 0x1e7   :  { %306 = vsyncpa [#allocation4], 1 }
 0x1e8   :  { %307 = vsyncpa [#allocation6], 1 }

</bundles_post_ra>
